<compile_context>
chip_gen: v7x
topology: tpu7x:2x2x1
jax: 0.10.0
libtpu: 0.0.40
codegen_flags: <defaults>
</compile_context>

<pallas_src>
import functools
import math

import jax
import jax.numpy as jnp
from jax.experimental import pallas as pl
from jax.experimental.pallas import tpu as pltpu

# ---- module hyper-parameters (compartment_params, dt, gain_coef) ----
COMPARTMENT_PARAMS = {
    "V_rest": 0.0, "V_thre": 20.0,
    "g_L_s": 0.1, "g_L_d1": 0.1, "g_L_d2": 0.1,
    "g_d1_s": 0.1, "g_s_d1": 0.1, "g_d2_d1": 0.1, "g_d1_d2": 0.1,
}
GAIN_COEF = 10.0
DT = 1.0

LANE = 128             # lane-dense last dim
MAX_ROW_TILE = 1024    # 1024 x 128 x 4B = 512 KiB per f32 tile (raise to 2048 on v6e)
MAX_TIME_BLOCK = 8     # fused-sim: timesteps folded into one grid step
VMEM_LIMIT_BYTES = 32 * 1024 * 1024   # fits v5e/v6e (128 MiB phys) and v7x (64 MiB phys)


def _fold_coeffs(p=COMPARTMENT_PARAMS, dt=DT, gain=GAIN_COEF):
    """Host-folded constants: the module's Euler update, reassociated.

    V_s'  = (1 - dt*(gLs+gd1s))*V_s + dt*gd1s*V_d1 + dt*gain*I_s + dt*gLs*Vrest
    V_d1' = (1 - dt*(gLd1+gsd1+gd2d1))*V_d1 + dt*gsd1*V_s + dt*gd2d1*V_d2
            + dt*I_d1 + dt*gLd1*Vrest
    V_d2' = (1 - dt*(gLd2+gd1d2))*V_d2 + dt*gd1d2*V_d1 + dt*I_d2 + dt*gLd2*Vrest
    """
    return dict(
        a_s=1.0 - dt * (p["g_L_s"] + p["g_d1_s"]),
        b_s=dt * p["g_d1_s"],
        c_s=dt * gain,
        k_s=dt * p["g_L_s"] * p["V_rest"],
        a_d1=1.0 - dt * (p["g_L_d1"] + p["g_s_d1"] + p["g_d2_d1"]),
        b_d1s=dt * p["g_s_d1"],
        b_d1d2=dt * p["g_d2_d1"],
        c_d1=dt,
        k_d1=dt * p["g_L_d1"] * p["V_rest"],
        a_d2=1.0 - dt * (p["g_L_d2"] + p["g_d1_d2"]),
        b_d2=dt * p["g_d1_d2"],
        c_d2=dt,
        k_d2=dt * p["g_L_d2"] * p["V_rest"],
        v_rest=p["V_rest"],
        v_thre=p["V_thre"],
    )


_C = _fold_coeffs()


def _cmul(c, x):
    return x if c == 1.0 else c * x


def _update(V_s, V_d1, V_d2, I_s, I_d1, I_d2):
    """One folded membrane update + spike/reset. Pure elementwise jnp.

    Used both inside the kernels (on loaded tiles) and as the jnp reference.
    Returns (spike_soma, V_s_new, V_d1_new, V_d2_new).
    """
    c = _C
    V_s_new = c["a_s"] * V_s + c["b_s"] * V_d1 + _cmul(c["c_s"], I_s)
    if c["k_s"] != 0.0:
        V_s_new = V_s_new + c["k_s"]
    V_d1_new = (c["a_d1"] * V_d1 + c["b_d1s"] * V_s + c["b_d1d2"] * V_d2
                + _cmul(c["c_d1"], I_d1))
    if c["k_d1"] != 0.0:
        V_d1_new = V_d1_new + c["k_d1"]
    V_d2_new = c["a_d2"] * V_d2 + c["b_d2"] * V_d1 + _cmul(c["c_d2"], I_d2)
    if c["k_d2"] != 0.0:
        V_d2_new = V_d2_new + c["k_d2"]

    # strict > (torch .gt) then reset-to-V_rest; where-select == blend reset
    spike_s = V_s_new > c["v_thre"]
    V_s_new = jnp.where(spike_s, c["v_rest"], V_s_new)
    V_d1_new = jnp.where(V_d1_new > c["v_thre"], c["v_rest"], V_d1_new)
    V_d2_new = jnp.where(V_d2_new > c["v_thre"], c["v_rest"], V_d2_new)
    return spike_s.astype(V_s_new.dtype), V_s_new, V_d1_new, V_d2_new


# --------------------------------------------------------------------------
# Kernels
# --------------------------------------------------------------------------
def _step_kernel(vs_ref, vd1_ref, vd2_ref, is_ref, id1_ref, id2_ref,
                 spike_ref, vs_out_ref, vd1_out_ref, vd2_out_ref):
    spike, vs, vd1, vd2 = _update(vs_ref[...], vd1_ref[...], vd2_ref[...],
                                  is_ref[...], id1_ref[...], id2_ref[...])
    spike_ref[...] = spike
    vs_out_ref[...] = vs
    vd1_out_ref[...] = vd1
    vd2_out_ref[...] = vd2


def _sim_kernel(T_total, tb_size, need_mask,
                vs_in_ref, vd1_in_ref, vd2_in_ref, is_ref, id1_ref, id2_ref,
                spike_ref, vs_ref, vd1_ref, vd2_ref):
    """grid = (row_tiles, time_blocks).

    Membrane state accumulates directly in the state *output* blocks: their
    block index is time-invariant so they stay VMEM-resident across the whole
    time axis for a given row tile (no scratch, no explicit copy-out).
    Each grid step processes `tb_size` timesteps of current/spike data.
    """
    tb = pl.program_id(1)

    @pl.when(tb == 0)
    def _():
        vs_ref[...] = vs_in_ref[...]
        vd1_ref[...] = vd1_in_ref[...]
        vd2_ref[...] = vd2_in_ref[...]

    def substep(s):
        spike, vs, vd1, vd2 = _update(vs_ref[...], vd1_ref[...], vd2_ref[...],
                                      is_ref[s], id1_ref[s], id2_ref[s])
        spike_ref[s] = spike
        vs_ref[...] = vs
        vd1_ref[...] = vd1
        vd2_ref[...] = vd2

    for s in range(tb_size):
        if need_mask:
            # Last time block may extend past T; keep state untouched for the
            # padded steps (spike rows for padded steps are discarded on host).
            pl.when(tb * tb_size + s < T_total)(lambda s=s: substep(s))
        else:
            substep(s)


# --------------------------------------------------------------------------
# Layout helpers (host-side shape math only)
# --------------------------------------------------------------------------
def _round_up(x, m):
    return -(-x // m) * m


def _slab_geometry(total):
    """Balanced (rows, 128) tiling: small padding, >=2 tiles for megacore."""
    rows = _round_up(max(1, -(-total // LANE)), 8)
    # prefer >=2 row tiles so the "parallel" axis splits across v7x's 2 TCs
    n_tiles = max(-(-rows // MAX_ROW_TILE), 2 if rows > 8 else 1)
    row_tile = _round_up(-(-rows // n_tiles), 8)
    n_tiles = -(-rows // row_tile)
    return n_tiles * row_tile, row_tile, n_tiles


def _pick_time_block(T, max_tb):
    """Largest time block <= max_tb with minimal time padding."""
    cap = max(1, min(max_tb, T))
    lo = max(1, cap // 2)
    best, best_pad = cap, (-T) % cap
    for tb in range(cap, lo - 1, -1):
        pad = (-T) % tb
        if pad < best_pad:
            best, best_pad = tb, pad
    return best


def _to_slab(x, rows_padded):
    x = x.reshape(-1).astype(jnp.float32)
    pad = rows_padded * LANE - x.shape[0]
    if pad:
        x = jnp.pad(x, (0, pad))
    return x.reshape(rows_padded, LANE)


def _from_slab(x, orig_shape):
    total = math.prod(orig_shape)
    x = x.reshape(-1)
    if x.shape[0] != total:
        x = x[:total]
    return x.reshape(orig_shape)


# --------------------------------------------------------------------------
# Wrappers
# --------------------------------------------------------------------------
def multicompartment_forward(V_s, V_d1, V_d2, Iinj_s, Iinj_d1, Iinj_d2):
    """One timestep. Returns (spike, V_s_new, V_d1_new, V_d2_new), input-shaped.

    For repeated stepping prefer `multicompartment_simulate` (state stays in
    VMEM and host pad/slice conversions are amortized over all T steps).
    """
    orig_shape = Iinj_s.shape
    total = math.prod(orig_shape)
    rows_padded, row_tile, n_tiles = _slab_geometry(total)

    args = [_to_slab(a, rows_padded)
            for a in (V_s, V_d1, V_d2, Iinj_s, Iinj_d1, Iinj_d2)]
    sds = jax.ShapeDtypeStruct((rows_padded, LANE), jnp.float32)
    spec = pl.BlockSpec((row_tile, LANE), lambda i: (i, 0))

    spike, vs, vd1, vd2 = pl.pallas_call(
        _step_kernel,
        out_shape=(sds, sds, sds, sds),
        grid=(n_tiles,),
        in_specs=[spec] * 6,
        out_specs=(spec, spec, spec, spec),
        input_output_aliases={0: 1, 1: 2, 2: 3},   # V_s/V_d1/V_d2 updated in place
        compiler_params=pltpu.CompilerParams(
            dimension_semantics=("parallel",),
            vmem_limit_bytes=VMEM_LIMIT_BYTES),
    )(*args)

    f = lambda x: _from_slab(x, orig_shape)
    return f(spike), f(vs), f(vd1), f(vd2)


def multicompartment_simulate(V_s, V_d1, V_d2, Iinj_s, Iinj_d1, Iinj_d2):
    """T fused timesteps. Iinj_* have a leading time axis (T, *state_shape).

    Returns (spikes[T, ...], V_s_new, V_d1_new, V_d2_new). Membrane state stays
    VMEM-resident for the whole time loop (per row tile); the time axis is
    blocked so each grid step streams several timesteps of current/spike data.
    """
    T = Iinj_s.shape[0]
    state_shape = Iinj_s.shape[1:]
    total = math.prod(state_shape)
    rows_padded, row_tile, n_tiles = _slab_geometry(total)

    # VMEM budget: 8 time-blocked streams*2 bufs + 12 state blocks must fit.
    max_tb = MAX_TIME_BLOCK if row_tile <= 512 else 4
    tb_size = _pick_time_block(T, max_tb)
    n_tb = -(-T // tb_size)
    T_pad = n_tb * tb_size

    state = [_to_slab(a, rows_padded) for a in (V_s, V_d1, V_d2)]

    def to_tslab(x):
        x = x.reshape(T, -1).astype(jnp.float32)
        pad_l = rows_padded * LANE - x.shape[1]
        pad_t = T_pad - T
        if pad_l or pad_t:
            x = jnp.pad(x, ((0, pad_t), (0, pad_l)))
        return x.reshape(T_pad, rows_padded, LANE)

    currents = [to_tslab(a) for a in (Iinj_s, Iinj_d1, Iinj_d2)]

    state_sds = jax.ShapeDtypeStruct((rows_padded, LANE), jnp.float32)
    spike_sds = jax.ShapeDtypeStruct((T_pad, rows_padded, LANE), jnp.float32)
    state_spec = pl.BlockSpec((row_tile, LANE), lambda r, t: (r, 0))
    tcur_spec = pl.BlockSpec((tb_size, row_tile, LANE), lambda r, t: (t, r, 0))

    kernel = functools.partial(_sim_kernel, T, tb_size, T_pad != T)

    spikes, vs, vd1, vd2 = pl.pallas_call(
        kernel,
        out_shape=(spike_sds, state_sds, state_sds, state_sds),
        grid=(n_tiles, n_tb),
        in_specs=[state_spec] * 3 + [tcur_spec] * 3,
        out_specs=(tcur_spec, state_spec, state_spec, state_spec),
        input_output_aliases={0: 1, 1: 2, 2: 3},
        compiler_params=pltpu.CompilerParams(
            dimension_semantics=("parallel", "arbitrary"),
            vmem_limit_bytes=VMEM_LIMIT_BYTES),
    )(*state, *currents)

    spikes = spikes.reshape(T_pad, rows_padded * LANE)[:T, :total]
    spikes = spikes.reshape((T,) + tuple(state_shape))
    f = lambda x: _from_slab(x, state_shape)
    return spikes, f(vs), f(vd1), f(vd2)


# --------------------------------------------------------------------------
# Reference (literal, unfused mirror of the torch module forward)
# --------------------------------------------------------------------------
def _reference_step_unfused(V_s, V_d1, V_d2, I_s, I_d1, I_d2):
    p = COMPARTMENT_PARAMS
    V_rest, V_thre = p["V_rest"], p["V_thre"]
    dVsdt = p["g_L_s"] * (V_s - V_rest) + p["g_d1_s"] * (V_s - V_d1) - GAIN_COEF * I_s
    dVd1dt = (p["g_L_d1"] * (V_d1 - V_rest) + p["g_s_d1"] * (V_d1 - V_s)
              + p["g_d2_d1"] * (V_d1 - V_d2) - I_d1)
    dVd2dt = p["g_L_d2"] * (V_d2 - V_rest) + p["g_d1_d2"] * (V_d2 - V_d1) - I_d2
    V_s = V_s - DT * dVsdt
    V_d1 = V_d1 - DT * dVd1dt
    V_d2 = V_d2 - DT * dVd2dt
    spike = (V_s > V_thre).astype(jnp.float32)
    spike_d1 = (V_d1 > V_thre).astype(jnp.float32)
    spike_d2 = (V_d2 > V_thre).astype(jnp.float32)
    V_s = spike * V_rest + (1.0 - spike) * V_s
    V_d1 = spike_d1 * V_rest + (1.0 - spike_d1) * V_d1
    V_d2 = spike_d2 * V_rest + (1.0 - spike_d2) * V_d2
    return spike, V_s, V_d1, V_d2


if __name__ == "__main__":
    key = jax.random.PRNGKey(0)
    k1, k2, k3, k4, k5, k6 = jax.random.split(key, 6)

    shape = (2, 4, 16, 16)   # (B, C, H, W) — NCHW like the torch module inputs
    T = 4

    # injected currents (soma currents scaled so some neurons cross V_thre=20)
    Iinj_s = jax.random.uniform(k1, (T,) + shape, jnp.float32, minval=-1.0, maxval=4.0)
    Iinj_d1 = jax.random.uniform(k2, (T,) + shape, jnp.float32, minval=-1.0, maxval=1.0)
    Iinj_d2 = jax.random.uniform(k3, (T,) + shape, jnp.float32, minval=-1.0, maxval=1.0)
    zeros = jnp.zeros(shape, jnp.float32)   # reset(): membrane state starts at 0

    fwd = jax.jit(multicompartment_forward)
    sim = jax.jit(multicompartment_simulate)

    # --- one step from rest: kernel vs the literal torch-style reference ---
    spike, V_s, V_d1, V_d2 = fwd(zeros, zeros, zeros,
                                 Iinj_s[0], Iinj_d1[0], Iinj_d2[0])
    jax.block_until_ready((spike, V_s, V_d1, V_d2))
    r_spike, rV_s, rV_d1, rV_d2 = _reference_step_unfused(
        zeros, zeros, zeros, Iinj_s[0], Iinj_d1[0], Iinj_d2[0])
    assert spike.shape == shape and spike.dtype == jnp.float32
    assert jnp.array_equal(spike, r_spike), "spike mismatch (1 step)"
    assert jnp.allclose(V_s, rV_s, atol=1e-5), "V_s mismatch (1 step)"
    assert jnp.allclose(V_d1, rV_d1, atol=1e-5), "V_d1 mismatch (1 step)"
    assert jnp.allclose(V_d2, rV_d2, atol=1e-5), "V_d2 mismatch (1 step)"

    # --- T steps with the single-step kernel vs pure-jnp folded reference ---
    kV = [zeros, zeros, zeros]
    rV = [zeros, zeros, zeros]
    ref_spikes = []
    for t in range(T):
        k_spike, *kV = fwd(*kV, Iinj_s[t], Iinj_d1[t], Iinj_d2[t])
        r_sp, *rV = _update(*rV, Iinj_s[t], Iinj_d1[t], Iinj_d2[t])
        ref_spikes.append(r_sp)
        assert jnp.array_equal(k_spike, r_sp), f"spike mismatch at step {t}"
    jax.block_until_ready(kV)
    for a, b, name in zip(kV, rV, ("V_s", "V_d1", "V_d2")):
        assert jnp.allclose(a, b, atol=1e-4), f"{name} mismatch after {T} steps"

    # --- fused T-step kernel vs the same reference trajectory ---
    spikes_f, fV_s, fV_d1, fV_d2 = sim(zeros, zeros, zeros,
                                       Iinj_s, Iinj_d1, Iinj_d2)
    jax.block_until_ready((spikes_f, fV_s, fV_d1, fV_d2))
    assert jnp.array_equal(spikes_f, jnp.stack(ref_spikes)), "fused spike mismatch"
    for a, b, name in zip((fV_s, fV_d1, fV_d2), rV, ("V_s", "V_d1", "V_d2")):
        assert jnp.allclose(a, b, atol=1e-4), f"fused {name} mismatch"

    # --- fused kernel with T that needs a masked (padded) final time block ---
    T2 = 13
    kk1, kk2, kk3 = jax.random.split(k4, 3)
    I2_s = jax.random.uniform(kk1, (T2,) + shape, jnp.float32, minval=-1.0, maxval=4.0)
    I2_d1 = jax.random.uniform(kk2, (T2,) + shape, jnp.float32, minval=-1.0, maxval=1.0)
    I2_d2 = jax.random.uniform(kk3, (T2,) + shape, jnp.float32, minval=-1.0, maxval=1.0)
    spikes2, mV_s, mV_d1, mV_d2 = sim(zeros, zeros, zeros, I2_s, I2_d1, I2_d2)
    jax.block_until_ready(spikes2)
    rV2 = [zeros, zeros, zeros]
    ref_spikes2 = []
    for t in range(T2):
        r_sp, *rV2 = _update(*rV2, I2_s[t], I2_d1[t], I2_d2[t])
        ref_spikes2.append(r_sp)
    assert jnp.array_equal(spikes2, jnp.stack(ref_spikes2)), "masked-sim spike mismatch"
    for a, b, name in zip((mV_s, mV_d1, mV_d2), rV2, ("V_s", "V_d1", "V_d2")):
        assert jnp.allclose(a, b, atol=1e-4), f"masked-sim {name} mismatch"

    # --- odd shape (not a multiple of 128 elements) exercises the padding path ---
    odd_shape = (3, 5, 7, 9)
    oI_s = jax.random.uniform(k4, odd_shape, jnp.float32, minval=-1.0, maxval=4.0)
    oI_d1 = jax.random.uniform(k5, odd_shape, jnp.float32, minval=-1.0, maxval=1.0)
    oI_d2 = jax.random.uniform(k6, odd_shape, jnp.float32, minval=-1.0, maxval=1.0)
    oz = jnp.zeros(odd_shape, jnp.float32)
    o_spike, oV_s, oV_d1, oV_d2 = fwd(oz, oz, oz, oI_s, oI_d1, oI_d2)
    jax.block_until_ready(o_spike)
    r_spike, rV_s, rV_d1, rV_d2 = _reference_step_unfused(oz, oz, oz, oI_s, oI_d1, oI_d2)
    assert jnp.array_equal(o_spike, r_spike), "spike mismatch (odd shape)"
    assert jnp.allclose(oV_s, rV_s, atol=1e-5), "V_s mismatch (odd shape)"
    assert jnp.allclose(oV_d1, rV_d1, atol=1e-5), "V_d1 mismatch (odd shape)"
    assert jnp.allclose(oV_d2, rV_d2, atol=1e-5), "V_d2 mismatch (odd shape)"

    print("KERNEL_OK")
</pallas_src>

<mosaic_0001>
module attributes {stable_mosaic.version = 11 : i64} {
  func.func @_step_kernel(%arg0: i32, %arg1: memref<8x128xf32, #tpu.memory_space<vmem>>, %arg2: memref<8x128xf32, #tpu.memory_space<vmem>>, %arg3: memref<8x128xf32, #tpu.memory_space<vmem>>, %arg4: memref<8x128xf32, #tpu.memory_space<vmem>>, %arg5: memref<8x128xf32, #tpu.memory_space<vmem>>, %arg6: memref<8x128xf32, #tpu.memory_space<vmem>>, %arg7: memref<8x128xf32, #tpu.memory_space<vmem>>, %arg8: memref<8x128xf32, #tpu.memory_space<vmem>>, %arg9: memref<8x128xf32, #tpu.memory_space<vmem>>, %arg10: memref<8x128xf32, #tpu.memory_space<vmem>>) attributes {dimension_semantics = [#tpu.dimension_semantics<parallel>], iteration_bounds = array<i64: 2>, scalar_prefetch = 0 : i64, scratch_operands = 0 : i64, tpu.core_type = #tpu.core_type<tc>, window_params = [{transform_indices = @transform_0, window_bounds = array<i64: 8, 128>}, {transform_indices = @transform_1, window_bounds = array<i64: 8, 128>}, {transform_indices = @transform_2, window_bounds = array<i64: 8, 128>}, {transform_indices = @transform_3, window_bounds = array<i64: 8, 128>}, {transform_indices = @transform_4, window_bounds = array<i64: 8, 128>}, {transform_indices = @transform_5, window_bounds = array<i64: 8, 128>}, {transform_indices = @transform_6, window_bounds = array<i64: 8, 128>}, {transform_indices = @transform_7, window_bounds = array<i64: 8, 128>}, {transform_indices = @transform_8, window_bounds = array<i64: 8, 128>}, {transform_indices = @transform_9, window_bounds = array<i64: 8, 128>}]} {
    %c0 = arith.constant 0 : index
    %c0_0 = arith.constant 0 : index
    %0 = vector.load %arg1[%c0, %c0_0] : memref<8x128xf32, #tpu.memory_space<vmem>>, vector<8x128xf32>
    %c0_1 = arith.constant 0 : index
    %c0_2 = arith.constant 0 : index
    %1 = vector.load %arg2[%c0_1, %c0_2] : memref<8x128xf32, #tpu.memory_space<vmem>>, vector<8x128xf32>
    %c0_3 = arith.constant 0 : index
    %c0_4 = arith.constant 0 : index
    %2 = vector.load %arg3[%c0_3, %c0_4] : memref<8x128xf32, #tpu.memory_space<vmem>>, vector<8x128xf32>
    %c0_5 = arith.constant 0 : index
    %c0_6 = arith.constant 0 : index
    %3 = vector.load %arg4[%c0_5, %c0_6] : memref<8x128xf32, #tpu.memory_space<vmem>>, vector<8x128xf32>
    %c0_7 = arith.constant 0 : index
    %c0_8 = arith.constant 0 : index
    %4 = vector.load %arg5[%c0_7, %c0_8] : memref<8x128xf32, #tpu.memory_space<vmem>>, vector<8x128xf32>
    %c0_9 = arith.constant 0 : index
    %c0_10 = arith.constant 0 : index
    %5 = vector.load %arg6[%c0_9, %c0_10] : memref<8x128xf32, #tpu.memory_space<vmem>>, vector<8x128xf32>
    %cst = arith.constant 8.000000e-01 : f32
    %6 = vector.broadcast %cst : f32 to vector<8x128xf32>
    %7 = arith.mulf %6, %0 : vector<8x128xf32>
    %cst_11 = arith.constant 1.000000e-01 : f32
    %8 = vector.broadcast %cst_11 : f32 to vector<8x128xf32>
    %9 = arith.mulf %8, %1 : vector<8x128xf32>
    %10 = arith.addf %7, %9 : vector<8x128xf32>
    %cst_12 = arith.constant 1.000000e+01 : f32
    %11 = vector.broadcast %cst_12 : f32 to vector<8x128xf32>
    %12 = arith.mulf %11, %3 : vector<8x128xf32>
    %13 = arith.addf %10, %12 : vector<8x128xf32>
    %cst_13 = arith.constant 0.699999988 : f32
    %14 = vector.broadcast %cst_13 : f32 to vector<8x128xf32>
    %15 = arith.mulf %14, %1 : vector<8x128xf32>
    %cst_14 = arith.constant 1.000000e-01 : f32
    %16 = vector.broadcast %cst_14 : f32 to vector<8x128xf32>
    %17 = arith.mulf %16, %0 : vector<8x128xf32>
    %18 = arith.addf %15, %17 : vector<8x128xf32>
    %cst_15 = arith.constant 1.000000e-01 : f32
    %19 = vector.broadcast %cst_15 : f32 to vector<8x128xf32>
    %20 = arith.mulf %19, %2 : vector<8x128xf32>
    %21 = arith.addf %18, %20 : vector<8x128xf32>
    %22 = arith.addf %21, %4 : vector<8x128xf32>
    %cst_16 = arith.constant 8.000000e-01 : f32
    %23 = vector.broadcast %cst_16 : f32 to vector<8x128xf32>
    %24 = arith.mulf %23, %2 : vector<8x128xf32>
    %cst_17 = arith.constant 1.000000e-01 : f32
    %25 = vector.broadcast %cst_17 : f32 to vector<8x128xf32>
    %26 = arith.mulf %25, %1 : vector<8x128xf32>
    %27 = arith.addf %24, %26 : vector<8x128xf32>
    %28 = arith.addf %27, %5 : vector<8x128xf32>
    %cst_18 = arith.constant 2.000000e+01 : f32
    %29 = vector.broadcast %cst_18 : f32 to vector<8x128xf32>
    %30 = arith.cmpf ogt, %13, %29 : vector<8x128xf32>
    %cst_19 = arith.constant 0.000000e+00 : f32
    %31 = vector.broadcast %cst_19 : f32 to vector<8x128xf32>
    %32 = arith.select %30, %31, %13 : vector<8x128xi1>, vector<8x128xf32>
    %cst_20 = arith.constant 2.000000e+01 : f32
    %33 = vector.broadcast %cst_20 : f32 to vector<8x128xf32>
    %34 = arith.cmpf ogt, %22, %33 : vector<8x128xf32>
    %cst_21 = arith.constant 0.000000e+00 : f32
    %35 = vector.broadcast %cst_21 : f32 to vector<8x128xf32>
    %36 = arith.select %34, %35, %22 : vector<8x128xi1>, vector<8x128xf32>
    %cst_22 = arith.constant 2.000000e+01 : f32
    %37 = vector.broadcast %cst_22 : f32 to vector<8x128xf32>
    %38 = arith.cmpf ogt, %28, %37 : vector<8x128xf32>
    %cst_23 = arith.constant 0.000000e+00 : f32
    %39 = vector.broadcast %cst_23 : f32 to vector<8x128xf32>
    %40 = arith.select %38, %39, %28 : vector<8x128xi1>, vector<8x128xf32>
    %41 = arith.extui %30 : vector<8x128xi1> to vector<8x128xi32>
    %42 = arith.sitofp %41 : vector<8x128xi32> to vector<8x128xf32>
    %c0_24 = arith.constant 0 : index
    %c0_25 = arith.constant 0 : index
    %43 = vector.load %arg7[%c0_24, %c0_25] : memref<8x128xf32, #tpu.memory_space<vmem>>, vector<8x128xf32>
    tpu.vector_store %arg7[%c0_24, %c0_25], %42 {strides = array<i32>} : memref<8x128xf32, #tpu.memory_space<vmem>>, vector<8x128xf32>,
    %c0_26 = arith.constant 0 : index
    %c0_27 = arith.constant 0 : index
    %44 = vector.load %arg8[%c0_26, %c0_27] : memref<8x128xf32, #tpu.memory_space<vmem>>, vector<8x128xf32>
    tpu.vector_store %arg8[%c0_26, %c0_27], %32 {strides = array<i32>} : memref<8x128xf32, #tpu.memory_space<vmem>>, vector<8x128xf32>,
    %c0_28 = arith.constant 0 : index
    %c0_29 = arith.constant 0 : index
    %45 = vector.load %arg9[%c0_28, %c0_29] : memref<8x128xf32, #tpu.memory_space<vmem>>, vector<8x128xf32>
    tpu.vector_store %arg9[%c0_28, %c0_29], %36 {strides = array<i32>} : memref<8x128xf32, #tpu.memory_space<vmem>>, vector<8x128xf32>,
    %c0_30 = arith.constant 0 : index
    %c0_31 = arith.constant 0 : index
    %46 = vector.load %arg10[%c0_30, %c0_31] : memref<8x128xf32, #tpu.memory_space<vmem>>, vector<8x128xf32>
    tpu.vector_store %arg10[%c0_30, %c0_31], %40 {strides = array<i32>} : memref<8x128xf32, #tpu.memory_space<vmem>>, vector<8x128xf32>,
    return
  }
  func.func @transform_0(%arg0: i32) -> (i32, i32) {
    %c0_i32 = arith.constant 0 : i32
    %c0_i32_0 = arith.constant 0 : i32
    return %arg0, %c0_i32 : i32, i32
  }
  func.func @transform_1(%arg0: i32) -> (i32, i32) {
    %c0_i32 = arith.constant 0 : i32
    %c0_i32_0 = arith.constant 0 : i32
    return %arg0, %c0_i32 : i32, i32
  }
  func.func @transform_2(%arg0: i32) -> (i32, i32) {
    %c0_i32 = arith.constant 0 : i32
    %c0_i32_0 = arith.constant 0 : i32
    return %arg0, %c0_i32 : i32, i32
  }
  func.func @transform_3(%arg0: i32) -> (i32, i32) {
    %c0_i32 = arith.constant 0 : i32
    %c0_i32_0 = arith.constant 0 : i32
    return %arg0, %c0_i32 : i32, i32
  }
  func.func @transform_4(%arg0: i32) -> (i32, i32) {
    %c0_i32 = arith.constant 0 : i32
    %c0_i32_0 = arith.constant 0 : i32
    return %arg0, %c0_i32 : i32, i32
  }
  func.func @transform_5(%arg0: i32) -> (i32, i32) {
    %c0_i32 = arith.constant 0 : i32
    %c0_i32_0 = arith.constant 0 : i32
    return %arg0, %c0_i32 : i32, i32
  }
  func.func @transform_6(%arg0: i32) -> (i32, i32) {
    %c0_i32 = arith.constant 0 : i32
    %c0_i32_0 = arith.constant 0 : i32
    return %arg0, %c0_i32 : i32, i32
  }
  func.func @transform_7(%arg0: i32) -> (i32, i32) {
    %c0_i32 = arith.constant 0 : i32
    %c0_i32_0 = arith.constant 0 : i32
    return %arg0, %c0_i32 : i32, i32
  }
  func.func @transform_8(%arg0: i32) -> (i32, i32) {
    %c0_i32 = arith.constant 0 : i32
    %c0_i32_0 = arith.constant 0 : i32
    return %arg0, %c0_i32 : i32, i32
  }
  func.func @transform_9(%arg0: i32) -> (i32, i32) {
    %c0_i32 = arith.constant 0 : i32
    %c0_i32_0 = arith.constant 0 : i32
    return %arg0, %c0_i32 : i32, i32
  }
}

</mosaic_0001>

<bundles_post_ra>
// kernel: multicompartment_forward.1
= control target key start
LH: loop header
LB: loop body
LE: loop exit
PB: predicated region body
PF: predicated region fallthrough
CT: control target
= control target key end

     0   :  { %s768_s30 = smov 0   ;;  %s821_s0 = inlined_call_operand.vmem [shape: f32[16,128], index: 0, kind: input, shape index: {}, may-alias: {0,7}]   ;;  %s822_s1 = inlined_call_operand.vmem [shape: f32[16,128], index: 1, kind: input, shape index: {}, may-alias: {1,8}]   ;;  %s823_s2 = inlined_call_operand.vmem [shape: f32[16,128], index: 2, kind: input, shape index: {}, may-alias: {2,9}]   ;;  %s824_s3 = inlined_call_operand.vmem [shape: f32[16,128], index: 3, kind: input, shape index: {}]   ;;  %s825_s4 = inlined_call_operand.vmem [shape: f32[16,128], index: 4, kind: input, shape index: {}]   ;;  %s826_s5 = inlined_call_operand.vmem [shape: f32[16,128], index: 5, kind: input, shape index: {}]   ;;  %s827_s6 = inlined_call_operand.vmem [shape: f32[16,128], index: 6, kind: output, shape index: {0}]   ;;  %s828_s7 = inlined_call_operand.vmem [shape: f32[16,128], index: 7, kind: output, shape index: {1}, may-alias: {0,7}]   ;;  %s829_s8 = inlined_call_operand.vmem [shape: f32[16,128], index: 8, kind: output, shape index: {2}, may-alias: {1,8}]   ;;  %s830_s9 = inlined_call_operand.vmem [shape: f32[16,128], index: 9, kind: output, shape index: {3}, may-alias: {2,9}]  }
   0x1 LB: > { %s682_s10 = sadd.s32 4294967295, %s715_s30   ;;  %p686_p0 = scmp.ge.s32.totalorder %s715_s30, 1  ;;  %s715_s30 = sphi %s768_s30, %s20_s30  }
   0x2   : > { %p338_p1 = scmp.lt.s32.totalorder %s715_s30, 3 }
   0x4   : > { %p339_p2 = pnand %p686_p0, %p338_p1 }
   0x5   : > { %p404_p3 = scmp.lt.s32.totalorder (!%p339_p2), %s682_s10, 1  ;;  %v717_v19 = vmov (!%p339_p2), 0.0  }
   0x6   : > { %342 = sbr.rel (%p339_p2) target bundleno = 29 (0x1d), region = 44 }
   0xd   : > { %s832_s10 = smov (!%p404_p3, %s682_s10), 1 }
   0xe   : > { %s776_s11 = sshll.u32 %s832_s10, 3 }
   0xf   : > { %s407_s14 = scalar_lea.vmem %s821_s0, %s776_s11  ;;  %s411_s17 = scalar_lea.vmem %s822_s1, %s776_s11 }
  0x10   : > { %s419_s20 = scalar_lea.vmem %s824_s3, %s776_s11  ;;  %v444_v0 = vld [vmem:[%s407_s14] sm:$0xff]  ;;  %s415_s23 = scalar_lea.vmem %s823_s2, %s776_s11 }
  0x11   : > { %v445_v1 = vld [vmem:[%s411_s17] sm:$0xff]  ;;  %v450_v3 = vmul.f32 0.8, %v444_v0  ;;  %s423_s26 = scalar_lea.vmem %s825_s4, %s776_s11  ;;  %v456_v8 = vmul.f32 0.1, %v444_v0  ;;  %s427_s29 = scalar_lea.vmem %s826_s5, %s776_s11 }
  0x12   : > { %v447_v2 = vld [vmem:[%s419_s20] sm:$0xff]  ;;  %v451_v4 = vmul.f32 0.1, %v445_v1  ;;  %v455_v7 = vmul.f32 0.7, %v445_v1  ;;  %s431_s13 = scalar_lea.vmem %s827_s6, %s776_s11  ;;  %s435_s16 = scalar_lea.vmem %s828_s7, %s776_s11 }
  0x13   : > { %v453_v5 = vmul.f32 10.0, %v447_v2  ;;  %v446_v6 = vld [vmem:[%s415_s23] sm:$0xff]  ;;  %s443_s19 = scalar_lea.vmem %s830_s9, %s776_s11  ;;  %s439_s22 = scalar_lea.vmem %s829_s8, %s776_s11 }
  0x14   : > { %v452_v9 = vadd.f32 %v451_v4, %v450_v3  ;;  %v458_v10 = vmul.f32 0.1, %v446_v6  ;;  %v461_v11 = vmul.f32 0.8, %v446_v6  ;;  %v457_v12 = vadd.f32 %v456_v8, %v455_v7  ;;  %v449_v13 = vld [vmem:[%s427_s29] sm:$0xff] }
  0x15   : > { %v448_v15 = vld [vmem:[%s423_s26] sm:$0xff] }
  0x16   : > { %v454_v14 = vadd.f32 %v453_v5, %v452_v9  ;;  %v462_v16 = vadd.f32 %v461_v11, %v451_v4  ;;  %v459_v17 = vadd.f32 %v458_v10, %v457_v12 }
  0x18   : > { %vm464_vm0 = vcmp.gt.f32.partialorder %v454_v14, 20.0  ;;  %v463_v18 = vadd.f32 %v462_v16, %v449_v13  ;;  %v460_v22 = vadd.f32 %v459_v17, %v448_v15 }
  0x19   : > { %v697_v20 = vsel %vm464_vm0, 1.0, %v717_v19  ;;  %v465_v21 = vsel %vm464_vm0, 0.0, %v454_v14 }
  0x1a   : > { %472 = vst [vmem:[%s431_s13] sm:$0xff] %v697_v20  ;;  %473 = vst [vmem:[%s435_s16] sm:$0xff] %v465_v21  ;;  %vm468_vm1 = vcmp.gt.f32.partialorder %v463_v18, 20.0  ;;  %vm466_vm2 = vcmp.gt.f32.partialorder %v460_v22, 20.0 }
  0x1b   : > { %v469_v23 = vsel %vm468_vm1, 0.0, %v463_v18  ;;  %v467_v24 = vsel %vm466_vm2, 0.0, %v460_v22 }
  0x1c   : > { %475 = vst [vmem:[%s443_s19] sm:$0xff] %v469_v23  ;;  %474 = vst [vmem:[%s439_s22] sm:$0xff] %v467_v24 }
  0x1d PF: > { %s20_s30 = sadd.s32 1, %s715_s30  }
  0x1e   : > { %p17_p4 = scmp.ge.s32.totalorder %s20_s30, 4  }
  0x20   :  { %19 = sbr.rel (!%p17_p4) target bundleno = 1 (0x1), region = 125 }

</bundles_post_ra>
